<compile_context>
chip_gen: v6e
topology: v6e:2x2x1
jax: 0.10.0
libtpu: 0.0.40
codegen_flags: <defaults>
</compile_context>

<pallas_src>
import jax
import jax.numpy as jnp
from jax.experimental import pallas as pl
from jax.experimental.pallas import tpu as pltpu

IN_DIM = 32     # fc1 in_features
HID_DIM = 16    # fc1 out / fc2 in
OUT_DIM = 10    # fc2 out_features (true logits width)
OUT_PAD = 128   # lane-dense padded logits width (multiple of 128)


def _classifier_kernel(z_ref, w1_ref, b1_ref, w2p_ref, b2p_ref, out_ref):
    # z_ref:   (TB, 32)   streamed batch tile
    # w1_ref:  (32, 16)   resident
    # b1_ref:  (1, 16)    resident
    # w2p_ref: (16, 128)  resident, columns 10..128 are zero
    # b2p_ref: (1, 128)   resident, columns 10..128 are zero
    # out_ref: (TB, 128)  lane-dense padded logits
    h = jnp.dot(z_ref[...], w1_ref[...], preferred_element_type=jnp.float32)
    h = jnp.maximum(h + b1_ref[...], 0.0)                       # ReLU (f32)
    o = jnp.dot(h, w2p_ref[...], preferred_element_type=jnp.float32)
    out_ref[...] = (o + b2p_ref[...]).astype(out_ref.dtype)


def classifier_forward(z, w1, b1, w2, b2, *, tb=1024):
    """z: (B, 32) float32. w1: (32,16), b1: (1,16), w2: (16,10), b2: (1,10).

    Returns logits (B, 10) float32.
    """
    B = z.shape[0]

    # Zero-pad fc2 to a lane-dense 128-wide output so stores are unmasked vst.
    w2p = jnp.zeros((HID_DIM, OUT_PAD), w2.dtype).at[:, :OUT_DIM].set(w2)
    b2p = jnp.zeros((1, OUT_PAD), b2.dtype).at[:, :OUT_DIM].set(b2)

    # Batch tile: multiple of 8 sublanes, capped at `tb` (fits VMEM on v5e/v6e/v7x).
    TB = min(tb, max(8, ((B + 7) // 8) * 8))
    B_pad = ((B + TB - 1) // TB) * TB
    if B_pad != B:
        z = jnp.pad(z, ((0, B_pad - B), (0, 0)))

    grid = (B_pad // TB,)

    out_padded = pl.pallas_call(
        _classifier_kernel,
        out_shape=jax.ShapeDtypeStruct((B_pad, OUT_PAD), jnp.float32),
        grid=grid,
        in_specs=[
            pl.BlockSpec((TB, IN_DIM), lambda i: (i, 0)),        # stream z tiles
            pl.BlockSpec((IN_DIM, HID_DIM), lambda i: (0, 0)),   # resident w1
            pl.BlockSpec((1, HID_DIM), lambda i: (0, 0)),        # resident b1
            pl.BlockSpec((HID_DIM, OUT_PAD), lambda i: (0, 0)),  # resident w2 (padded)
            pl.BlockSpec((1, OUT_PAD), lambda i: (0, 0)),        # resident b2 (padded)
        ],
        out_specs=pl.BlockSpec((TB, OUT_PAD), lambda i: (i, 0)),
        compiler_params=pltpu.CompilerParams(
            dimension_semantics=("parallel",),
        ),
    )(z, w1, b1, w2p, b2p)

    # Slice back to the true batch and the true 10 logit columns.
    return out_padded[:B, :OUT_DIM]


def init_params(key):
    """Deterministic init mirroring nn.Linear default (uniform +/- 1/sqrt(fan_in))."""
    k1, k2, k3, k4 = jax.random.split(key, 4)
    bound1 = 1.0 / jnp.sqrt(32.0)
    bound2 = 1.0 / jnp.sqrt(16.0)
    # stored as (in_features, out_features) so the kernel does z @ W
    w1 = jax.random.uniform(k1, (IN_DIM, HID_DIM), jnp.float32, -bound1, bound1)
    b1 = jax.random.uniform(k2, (1, HID_DIM), jnp.float32, -bound1, bound1)
    w2 = jax.random.uniform(k3, (HID_DIM, OUT_DIM), jnp.float32, -bound2, bound2)
    b2 = jax.random.uniform(k4, (1, OUT_DIM), jnp.float32, -bound2, bound2)
    return w1, b1, w2, b2


def reference_forward(z, w1, b1, w2, b2):
    h = jnp.maximum(z @ w1 + b1, 0.0)
    return h @ w2 + b2


if __name__ == "__main__":
    key = jax.random.PRNGKey(0)
    k_params, k_input = jax.random.split(key)

    w1, b1, w2, b2 = init_params(k_params)

    # Small sanity shape (batch=8, latent dim=32), matching the PyTorch module.
    z = jax.random.normal(k_input, (8, IN_DIM), jnp.float32)

    out = classifier_forward(z, w1, b1, w2, b2)
    out = jax.block_until_ready(out)

    ref = reference_forward(z, w1, b1, w2, b2)
    assert out.shape == (8, OUT_DIM)
    assert jnp.allclose(out, ref, atol=1e-5, rtol=1e-5)

    # Exercise the batch-tiled path (multiple grid steps + batch padding).
    z_big = jax.random.normal(jax.random.PRNGKey(1), (2500, IN_DIM), jnp.float32)
    out_big = jax.block_until_ready(classifier_forward(z_big, w1, b1, w2, b2))
    ref_big = reference_forward(z_big, w1, b1, w2, b2)
    assert out_big.shape == (2500, OUT_DIM)
    assert jnp.allclose(out_big, ref_big, atol=1e-5, rtol=1e-5)

    print("KERNEL_OK")
</pallas_src>

<mosaic_0001>
module attributes {stable_mosaic.version = 11 : i64} {
  func.func @_classifier_kernel(%arg0: i32, %arg1: memref<8x32xf32, #tpu.memory_space<vmem>>, %arg2: memref<32x16xf32, #tpu.memory_space<vmem>>, %arg3: memref<1x16xf32, #tpu.memory_space<vmem>>, %arg4: memref<16x128xf32, #tpu.memory_space<vmem>>, %arg5: memref<1x128xf32, #tpu.memory_space<vmem>>, %arg6: memref<8x128xf32, #tpu.memory_space<vmem>>) attributes {dimension_semantics = [#tpu.dimension_semantics<parallel>], iteration_bounds = array<i64: 1>, scalar_prefetch = 0 : i64, scratch_operands = 0 : i64, tpu.core_type = #tpu.core_type<tc>, window_params = [{transform_indices = @transform_0, window_bounds = array<i64: 8, 32>}, {pipeline_mode = #tpu.pipeline_mode<synchronous>, transform_indices = @transform_1, window_bounds = array<i64: 32, 16>}, {pipeline_mode = #tpu.pipeline_mode<synchronous>, transform_indices = @transform_2, window_bounds = array<i64: 1, 16>}, {pipeline_mode = #tpu.pipeline_mode<synchronous>, transform_indices = @transform_3, window_bounds = array<i64: 16, 128>}, {pipeline_mode = #tpu.pipeline_mode<synchronous>, transform_indices = @transform_4, window_bounds = array<i64: 1, 128>}, {transform_indices = @transform_5, window_bounds = array<i64: 8, 128>}]} {
    %c0 = arith.constant 0 : index
    %c0_0 = arith.constant 0 : index
    %0 = vector.load %arg1[%c0, %c0_0] : memref<8x32xf32, #tpu.memory_space<vmem>>, vector<8x32xf32>
    %c0_1 = arith.constant 0 : index
    %c0_2 = arith.constant 0 : index
    %1 = vector.load %arg2[%c0_1, %c0_2] : memref<32x16xf32, #tpu.memory_space<vmem>>, vector<32x16xf32>
    %cst = arith.constant dense<0.000000e+00> : vector<8x16xf32>
    %2 = tpu.matmul %0, %1, %cst {dimension_numbers = #tpu.dot_dimension_numbers<[1], [0], [0], [1], [0, 0, 1, 1], [], []>} : vector<8x32xf32>, vector<32x16xf32>, vector<8x16xf32> -> vector<8x16xf32>
    %c0_3 = arith.constant 0 : index
    %c0_4 = arith.constant 0 : index
    %3 = vector.load %arg3[%c0_3, %c0_4] : memref<1x16xf32, #tpu.memory_space<vmem>>, vector<1x16xf32>
    %4 = vector.broadcast %3 : vector<1x16xf32> to vector<8x16xf32>
    %5 = arith.addf %2, %4 : vector<8x16xf32>
    %cst_5 = arith.constant 0.000000e+00 : f32
    %6 = vector.broadcast %cst_5 : f32 to vector<8x16xf32>
    %7 = arith.maximumf %5, %6 : vector<8x16xf32>
    %c0_6 = arith.constant 0 : index
    %c0_7 = arith.constant 0 : index
    %8 = vector.load %arg4[%c0_6, %c0_7] : memref<16x128xf32, #tpu.memory_space<vmem>>, vector<16x128xf32>
    %cst_8 = arith.constant dense<0.000000e+00> : vector<8x128xf32>
    %9 = tpu.matmul %7, %8, %cst_8 {dimension_numbers = #tpu.dot_dimension_numbers<[1], [0], [0], [1], [0, 0, 1, 1], [], []>} : vector<8x16xf32>, vector<16x128xf32>, vector<8x128xf32> -> vector<8x128xf32>
    %c0_9 = arith.constant 0 : index
    %c0_10 = arith.constant 0 : index
    %10 = vector.load %arg5[%c0_9, %c0_10] : memref<1x128xf32, #tpu.memory_space<vmem>>, vector<1x128xf32>
    %11 = vector.broadcast %10 : vector<1x128xf32> to vector<8x128xf32>
    %12 = arith.addf %9, %11 : vector<8x128xf32>
    %c0_11 = arith.constant 0 : index
    %c0_12 = arith.constant 0 : index
    %13 = vector.load %arg6[%c0_11, %c0_12] : memref<8x128xf32, #tpu.memory_space<vmem>>, vector<8x128xf32>
    tpu.vector_store %arg6[%c0_11, %c0_12], %12 {strides = array<i32>} : memref<8x128xf32, #tpu.memory_space<vmem>>, vector<8x128xf32>,
    return
  }
  func.func @transform_0(%arg0: i32) -> (i32, i32) {
    %c0_i32 = arith.constant 0 : i32
    %c0_i32_0 = arith.constant 0 : i32
    return %arg0, %c0_i32 : i32, i32
  }
  func.func @transform_1(%arg0: i32) -> (i32, i32) {
    %c0_i32 = arith.constant 0 : i32
    %c0_i32_0 = arith.constant 0 : i32
    %c0_i32_1 = arith.constant 0 : i32
    return %c0_i32, %c0_i32_0 : i32, i32
  }
  func.func @transform_2(%arg0: i32) -> (i32, i32) {
    %c0_i32 = arith.constant 0 : i32
    %c0_i32_0 = arith.constant 0 : i32
    %c0_i32_1 = arith.constant 0 : i32
    return %c0_i32, %c0_i32_0 : i32, i32
  }
  func.func @transform_3(%arg0: i32) -> (i32, i32) {
    %c0_i32 = arith.constant 0 : i32
    %c0_i32_0 = arith.constant 0 : i32
    %c0_i32_1 = arith.constant 0 : i32
    return %c0_i32, %c0_i32_0 : i32, i32
  }
  func.func @transform_4(%arg0: i32) -> (i32, i32) {
    %c0_i32 = arith.constant 0 : i32
    %c0_i32_0 = arith.constant 0 : i32
    %c0_i32_1 = arith.constant 0 : i32
    return %c0_i32, %c0_i32_0 : i32, i32
  }
  func.func @transform_5(%arg0: i32) -> (i32, i32) {
    %c0_i32 = arith.constant 0 : i32
    %c0_i32_0 = arith.constant 0 : i32
    return %arg0, %c0_i32 : i32, i32
  }
}

</mosaic_0001>

<bundles_post_ra>
// kernel: tpu_custom_call.1
= control target key start
LH: loop header
LB: loop body
LE: loop exit
PB: predicated region body
PF: predicated region fallthrough
CT: control target
= control target key end

     0   :  { %v261_v1 = vmov 0.0   ;;  %vm262_vm0 = vmmov 0   ;;  %s324_s0 = inlined_call_operand.vmem [shape: f32[8,32], index: 0, kind: input, shape index: {}]   ;;  %s325_s1 = inlined_call_operand.vmem [shape: f32[32,16], index: 1, kind: input, shape index: {}]   ;;  %s326_s2 = inlined_call_operand.vmem [shape: f32[1,16], index: 2, kind: input, shape index: {}]   ;;  %s327_s3 = inlined_call_operand.vmem [shape: f32[16,128], index: 3, kind: input, shape index: {}]   ;;  %s328_s4 = inlined_call_operand.vmem [shape: f32[1,128], index: 4, kind: input, shape index: {}]   ;;  %s329_s5 = inlined_call_operand.hbm [shape: f32[8,128], index: 5, kind: output, shape index: {}]  }
   0x1   :  { %v25_v0 = vld [vmem:[%s325_s1 + $0x18] sm:$0xff]  ;;  %218 = vmatprep.subr.mxu0 %v261_v1  ;;  %v24_v2 = vld [vmem:[%s325_s1 + $0x10] sm:$0xff]  ;;  %226 = vmatprep.mubr.msk.f32.mxu0 %vm262_vm0, %v261_v1 }
   0x2   :  { %219 = vmatpush3.msra.mxu0 %v25_v0  ;;  %229 = vmatprep.subr.mxu1 %v261_v1 }
   0x3   :  { %10 = vsyncpa [#allocation3], 0  ;;  %220 = vmatprep.subr.mxu0 %v261_v1  ;;  %v23_v3 = vld [vmem:[%s325_s1 + $0x8] sm:$0xff]  ;;  %233 = vmatprep.mubr.msk.f32.mxu1 %vm262_vm0, %v261_v1  ;;  %v22_v4 = vld [vmem:[%s325_s1] sm:$0xff]  ;;  %vm33_vm1 = vcmask 261120   ;;  %vm117_vm2 = vcmask 130048  }
   0x4   :  { %221 = vmatpush3.msra.mxu0 %v24_v2  ;;  %v21_v5 = vld [vmem:[%s324_s0] sm:$0xff]  ;;  %v109_v6 = vld [vmem:[%s327_s3 + $0x8] sm:$0xff]  ;;  %s263_s9 = smov [#allocation2]  }
   0x5   :  { %222 = vmatprep.subr.mxu0 %v261_v1  ;;  %230 = vmatpush3.msra.mxu1 %v109_v6  ;;  %v108_v7 = vld [vmem:[%s327_s3] sm:$0xff]  ;;  %s198_s10 = sshll.u32 %s263_s9, 4  ;;  %s199_s10 = int_to_ptr.vmem [resolvable:$true] %s198_s10 }
   0x6   :  { %223 = vmatpush3.msra.mxu0 %v23_v3  ;;  %231 = vmatprep.subr.mxu1 %v261_v1  ;;  %v206_v8 = vld [vmem:[%s326_s2] ss:$0 sm:$0xff]  ;;  %s239_s3 = scalar_lea.vmem %s199_s10, 128  ;;  %p244_p1 = scmp.lt.s32.totalorder %s199_s10, %s199_s10 }
   0x7   :  { %224 = vmatprep.subr.mxu0 %v261_v1  ;;  %232 = vmatpush3.msra.mxu1 %v108_v7  ;;  %v208_v13 = vld [vmem:[%s328_s4] ss:$0 sm:$0xff]  ;;  %p240_p0 = scmp.ne.s32.totalorder %s199_s10, %s239_s3  ;;  %p245_p2 = scmp.lt.s32.totalorder %s239_s3, %s239_s3 }
   0x8   :  { %225 = vmatpush3.msra.mxu0 %v22_v4 }
   0x9   :  { %227 = vmatmul.mubr.msk.f32.vlgmr.msra.gmra.mxu0 %vm33_vm1, %v21_v5  ;;  %p246_p3 = por %p245_p2, %p244_p1 }
   0xb   :  { %p247_p4 = pnand %p246_p3, %p240_p0 }
  0xc9   :  { %v103_v9 = vpop.f32.mrf.mxu0 }
  0xca   :  { %v104_v10 = vadd.f32 %v206_v8, %v103_v9 }
  0xcb   :  { %v228_v11 = vpop.f32.mrf.mxu0 }
  0xcc   :  { %v107_v12 = vmax.f32 %v104_v10, 0.0 }
  0xce   :  { %234 = vmatmul.mubr.msk.f32.vlgmr.msra.gmra.mxu1 %vm117_vm2, %v107_v12 }
 0x18e   :  { %v187_v14 = vpop.f32.mrf.mxu1 }
 0x18f   :  { %v188_v15 = vadd.f32 %v208_v13, %v187_v14 }
 0x190   :  { %v235_v16 = vpop.f32.mrf.mxu1 }
 0x191   :  { %191 = vst [vmem:[#allocation2] sm:$0xff] %v188_v15 }
 0x192   :  { %250 = shalt.err (!%p247_p4)
}
 0x193   :  { %201 = dma.vmem_to_hbm [thread:$0]  %s199_s10, 128, %s329_s5, [#allocation3]  }
 0x194   :  { %259 = dma.done.wait [#allocation3], 128  }
 0x195   :  { %260 = vsyncadd [#allocation3], 4294967168 }
 0x196   :  { %205 = vsyncpa [#allocation3], 1 }

</bundles_post_ra>
